<compile_context>
chip_gen: v5e
topology: v5e:2x2
jax: 0.10.0
libtpu: 0.0.40
codegen_flags: <defaults>
</compile_context>

<pallas_src>
import numpy as np
import jax
import jax.numpy as jnp
from jax.experimental import pallas as pl
from jax.experimental.pallas import tpu as pltpu


def _transition_pool_kernel(x_ref, scale_ref, shift_ref, w1t_ref, w12t_ref, pool_ref,
                            resize_ref, reduce_ref):
    # x_ref:      (1, Cin, TS)      bf16  -- TS = TH*W flattened spatial tile (lane-dense)
    # scale_ref:  (Cin, 1)          f32   -- folded BN scale  (gamma / sqrt(var+eps))
    # shift_ref:  (Cin, 1)          f32   -- folded BN shift  (beta - mean*scale)
    # w1t_ref:    (Cout, Cin)       bf16  -- main 1x1 conv, transposed
    # w12t_ref:   (Ch, Cin)         bf16  -- (w1 @ w2)^T: fused main+reduce 1x1 convs
    # pool_ref:   (TS, TS//4)       bf16  -- 2x2 average-pool matrix (four 0.25 taps / column)
    # resize_ref: (1, Cout, TS//4)  f32
    # reduce_ref: (1, Ch, TS)       f32
    x = x_ref[0].astype(jnp.float32)                                        # (Cin, TS)
    y = jnp.maximum(x * scale_ref[...] + shift_ref[...], 0.0)               # BN + ReLU (f32)
    yb = y.astype(jnp.bfloat16)

    # reduce branch: 1x1 conv (Cin->Cout) then 1x1 conv (Cout->Ch) collapsed to one matmul.
    red = jnp.dot(w12t_ref[...], yb, preferred_element_type=jnp.float32)    # (Ch, TS)
    reduce_ref[...] = red.reshape(reduce_ref.shape)

    # resize branch: pool first (commutes with the 1x1 conv), then the main conv.
    pooled = jnp.dot(yb, pool_ref[...], preferred_element_type=jnp.float32)  # (Cin, TS//4)
    res = jnp.dot(w1t_ref[...], pooled.astype(jnp.bfloat16),
                  preferred_element_type=jnp.float32)                        # (Cout, TS//4)
    resize_ref[...] = res.reshape(resize_ref.shape)


def _pick_tile_rows(H, W, Cin, Cout, Ch,
                    block_budget_bytes=32 * 1024 * 1024,
                    pool_mat_budget_bytes=4 * 1024 * 1024):
    """Largest even row-tile TH (divisor of H) whose double-buffered blocks fit the budget."""
    best = None
    for th in range(2, H + 1, 2):
        if H % th != 0:
            continue
        ts = th * W
        if th != H and ts % 512 != 0:            # keep all block lane dims multiples of 128
            continue
        pool_bytes = ts * (ts // 4) * 2                                      # bf16 pool matrix
        blocks = 2 * (Cin * ts * 2 + Ch * ts * 4 + Cout * (ts // 4) * 4)     # double-buffered
        if pool_bytes <= pool_mat_budget_bytes and blocks + pool_bytes <= block_budget_bytes:
            best = th
    if best is None:
        raise ValueError("no valid row tile for H=%d W=%d" % (H, W))
    return best


def transition_pool(x_nchw, w1, w2, gamma, beta, eps=1e-5):
    """_Transition(mode='pool').forward (train-mode BatchNorm) -> (resize, reduce), NCHW."""
    N, Cin, H, W = x_nchw.shape
    assert H % 2 == 0 and W % 2 == 0, "2x2 average pooling needs even H and W"
    Cout = w1.shape[1]
    Ch = w2.shape[1]
    S = H * W

    # NCHW kept end-to-end; only free reshapes of the contiguous spatial dims.
    x_flat = x_nchw.reshape(N, Cin, S)

    # Train-mode BatchNorm statistics (biased variance over N,H,W), folded to scale/shift.
    # TODO(synk): fuse this reduction into a first-pass Pallas kernel (or use running stats in
    #             eval mode) so x is not read an extra time from HBM.
    xf = x_flat.astype(jnp.float32)
    mean = jnp.mean(xf, axis=(0, 2))
    var = jnp.var(xf, axis=(0, 2))
    inv = gamma.astype(jnp.float32) / jnp.sqrt(var + eps)
    scale = inv.reshape(Cin, 1)
    shift = (beta.astype(jnp.float32) - mean * inv).reshape(Cin, 1)

    # Weights: transpose for channel-first matmuls, fuse the reduce branch (w12 = w1 @ w2),
    # cast to bf16 for MXU / HBM.
    w1f = jnp.asarray(w1, jnp.float32)
    w2f = jnp.asarray(w2, jnp.float32)
    w1t = w1f.T.astype(jnp.bfloat16)                       # (Cout, Cin)
    w12t = (w1f @ w2f).T.astype(jnp.bfloat16)              # (Ch, Cin)

    TH = _pick_tile_rows(H, W, Cin, Cout, Ch)
    TS = TH * W

    # 2x2 average-pool matrix for one flattened (TH, W) tile: column r*(W/2)+m averages the
    # four taps (2r+dr)*W + (2m+dc).  0.25 is exact in bf16.
    # TODO(synk): for very wide tiles replace this with a strided-load based reduction.
    rr = np.arange(TH // 2)[:, None]
    mm = np.arange(W // 2)[None, :]
    cols = (rr * (W // 2) + mm).ravel()
    pool_mat = np.zeros((TS, TS // 4), np.float32)
    for dr in (0, 1):
        for dc in (0, 1):
            rows = ((2 * rr + dr) * W + 2 * mm + dc).ravel()
            pool_mat[rows, cols] = 0.25
    pool_mat = jnp.asarray(pool_mat, jnp.bfloat16)

    x_bf = x_flat.astype(jnp.bfloat16)

    resize_flat, reduce_flat = pl.pallas_call(
        _transition_pool_kernel,
        out_shape=(
            jax.ShapeDtypeStruct((N, Cout, S // 4), jnp.float32),
            jax.ShapeDtypeStruct((N, Ch, S), jnp.float32),
        ),
        grid_spec=pltpu.PrefetchScalarGridSpec(
            num_scalar_prefetch=0,
            grid=(N, H // TH),
            in_specs=[
                pl.BlockSpec((1, Cin, TS), lambda n, h: (n, 0, h)),
                pl.BlockSpec((Cin, 1), lambda n, h: (0, 0)),
                pl.BlockSpec((Cin, 1), lambda n, h: (0, 0)),
                pl.BlockSpec((Cout, Cin), lambda n, h: (0, 0)),
                pl.BlockSpec((Ch, Cin), lambda n, h: (0, 0)),
                pl.BlockSpec((TS, TS // 4), lambda n, h: (0, 0)),
            ],
            out_specs=[
                pl.BlockSpec((1, Cout, TS // 4), lambda n, h: (n, 0, h)),
                pl.BlockSpec((1, Ch, TS), lambda n, h: (n, 0, h)),
            ],
        ),
        compiler_params=pltpu.CompilerParams(
            dimension_semantics=("parallel", "parallel"),
            vmem_limit_bytes=48 * 1024 * 1024,
        ),
    )(x_bf, scale, shift, w1t, w12t, pool_mat)

    resize = resize_flat.reshape(N, Cout, H // 2, W // 2)
    reduce_out = reduce_flat.reshape(N, Ch, H, W)
    return resize, reduce_out


def reference_pool(x_nchw, w1, w2, gamma, beta, eps=1e-5):
    """Pure-JAX f32 reference of the PyTorch forward (train-mode BN, mode='pool')."""
    x = x_nchw.astype(jnp.float32)
    mean = x.mean(axis=(0, 2, 3), keepdims=True)
    var = x.var(axis=(0, 2, 3), keepdims=True)
    g = gamma.reshape(1, -1, 1, 1)
    b = beta.reshape(1, -1, 1, 1)
    y = jnp.maximum((x - mean) / jnp.sqrt(var + eps) * g + b, 0.0)
    t = jnp.einsum('nchw,cd->ndhw', y, w1)
    red = jnp.einsum('ndhw,de->nehw', t, w2)
    n, c, h, w = t.shape
    pool = t.reshape(n, c, h // 2, 2, w // 2, 2).mean(axis=(3, 5))
    return pool, red


if __name__ == "__main__":
    # num_input_features=8, num_output_features=8 (reduce -> 4 channels), H=W=16, N=2
    N, Cin, Cout, H, W = 2, 8, 8, 16, 16
    Ch = Cout // 2

    key = jax.random.PRNGKey(0)
    kx, k1, k2 = jax.random.split(key, 3)

    x = jax.random.normal(kx, (N, Cin, H, W), jnp.float32)
    # Kaiming-normal init for the 1x1 convs (fan_in = Cin), stored as (Cin, Cout) matmul
    # weights; BatchNorm weight=1, bias=0 as in _init_weight().
    w1 = jax.random.normal(k1, (Cin, Cout), jnp.float32) * np.sqrt(2.0 / Cin)
    w2 = jax.random.normal(k2, (Cout, Ch), jnp.float32) * np.sqrt(2.0 / Cout)
    gamma = jnp.ones((Cin,), jnp.float32)
    beta = jnp.zeros((Cin,), jnp.float32)

    resize, reduce_out = transition_pool(x, w1, w2, gamma, beta)
    resize = jax.block_until_ready(resize)
    reduce_out = jax.block_until_ready(reduce_out)

    ref_resize, ref_reduce = reference_pool(x, w1, w2, gamma, beta)

    assert resize.shape == (N, Cout, H // 2, W // 2), resize.shape
    assert reduce_out.shape == (N, Ch, H, W), reduce_out.shape
    # bf16 input/weight path vs. pure-f32 reference -> modest tolerance.
    np.testing.assert_allclose(np.asarray(resize), np.asarray(ref_resize),
                               rtol=5e-2, atol=5e-2)
    np.testing.assert_allclose(np.asarray(reduce_out), np.asarray(ref_reduce),
                               rtol=5e-2, atol=5e-2)

    print("KERNEL_OK")
</pallas_src>

<mosaic_0001>
module attributes {stable_mosaic.version = 11 : i64} {
  func.func @_transition_pool_kernel(%arg0: i32, %arg1: i32, %arg2: memref<1x8x256xbf16, #tpu.memory_space<vmem>>, %arg3: memref<8x1xf32, #tpu.memory_space<vmem>>, %arg4: memref<8x1xf32, #tpu.memory_space<vmem>>, %arg5: memref<8x8xbf16, #tpu.memory_space<vmem>>, %arg6: memref<4x8xbf16, #tpu.memory_space<vmem>>, %arg7: memref<256x64xbf16, #tpu.memory_space<vmem>>, %arg8: memref<1x8x64xf32, #tpu.memory_space<vmem>>, %arg9: memref<1x4x256xf32, #tpu.memory_space<vmem>>) attributes {dimension_semantics = [#tpu.dimension_semantics<parallel>, #tpu.dimension_semantics<parallel>], iteration_bounds = array<i64: 2, 1>, scalar_prefetch = 0 : i64, scratch_operands = 0 : i64, tpu.core_type = #tpu.core_type<tc>, window_params = [{transform_indices = @transform_0, window_bounds = array<i64: 1, 8, 256>}, {pipeline_mode = #tpu.pipeline_mode<synchronous>, transform_indices = @transform_1, window_bounds = array<i64: 8, 1>}, {pipeline_mode = #tpu.pipeline_mode<synchronous>, transform_indices = @transform_2, window_bounds = array<i64: 8, 1>}, {pipeline_mode = #tpu.pipeline_mode<synchronous>, transform_indices = @transform_3, window_bounds = array<i64: 8, 8>}, {pipeline_mode = #tpu.pipeline_mode<synchronous>, transform_indices = @transform_4, window_bounds = array<i64: 4, 8>}, {pipeline_mode = #tpu.pipeline_mode<synchronous>, transform_indices = @transform_5, window_bounds = array<i64: 256, 64>}, {transform_indices = @transform_6, window_bounds = array<i64: 1, 8, 64>}, {transform_indices = @transform_7, window_bounds = array<i64: 1, 4, 256>}]} {
    %c0 = arith.constant 0 : index
    %c0_0 = arith.constant 0 : index
    %c0_1 = arith.constant 0 : index
    %0 = vector.load %arg2[%c0, %c0_0, %c0_1] : memref<1x8x256xbf16, #tpu.memory_space<vmem>>, vector<1x8x256xbf16>
    %1 = vector.shape_cast %0 : vector<1x8x256xbf16> to vector<8x256xbf16>
    %2 = arith.extf %1 : vector<8x256xbf16> to vector<8x256xf32>
    %c0_2 = arith.constant 0 : index
    %c0_3 = arith.constant 0 : index
    %3 = vector.load %arg3[%c0_2, %c0_3] : memref<8x1xf32, #tpu.memory_space<vmem>>, vector<8x1xf32>
    %4 = vector.broadcast %3 : vector<8x1xf32> to vector<8x256xf32>
    %5 = arith.mulf %2, %4 : vector<8x256xf32>
    %c0_4 = arith.constant 0 : index
    %c0_5 = arith.constant 0 : index
    %6 = vector.load %arg4[%c0_4, %c0_5] : memref<8x1xf32, #tpu.memory_space<vmem>>, vector<8x1xf32>
    %7 = vector.broadcast %6 : vector<8x1xf32> to vector<8x256xf32>
    %8 = arith.addf %5, %7 : vector<8x256xf32>
    %cst = arith.constant 0.000000e+00 : f32
    %9 = vector.broadcast %cst : f32 to vector<8x256xf32>
    %10 = arith.maximumf %8, %9 : vector<8x256xf32>
    %11 = arith.truncf %10 : vector<8x256xf32> to vector<8x256xbf16>
    %c0_6 = arith.constant 0 : index
    %c0_7 = arith.constant 0 : index
    %12 = vector.load %arg6[%c0_6, %c0_7] : memref<4x8xbf16, #tpu.memory_space<vmem>>, vector<4x8xbf16>
    %cst_8 = arith.constant dense<0.000000e+00> : vector<4x256xf32>
    %13 = tpu.matmul %12, %11, %cst_8 {dimension_numbers = #tpu.dot_dimension_numbers<[1], [0], [0], [1], [0, 0, 1, 1], [], []>} : vector<4x8xbf16>, vector<8x256xbf16>, vector<4x256xf32> -> vector<4x256xf32>
    %14 = vector.shape_cast %13 : vector<4x256xf32> to vector<1x4x256xf32>
    %c0_9 = arith.constant 0 : index
    %c0_10 = arith.constant 0 : index
    %c0_11 = arith.constant 0 : index
    %15 = vector.load %arg9[%c0_9, %c0_10, %c0_11] : memref<1x4x256xf32, #tpu.memory_space<vmem>>, vector<1x4x256xf32>
    tpu.vector_store %arg9[%c0_9, %c0_10, %c0_11], %14 {strides = array<i32>} : memref<1x4x256xf32, #tpu.memory_space<vmem>>, vector<1x4x256xf32>,
    %c0_12 = arith.constant 0 : index
    %c0_13 = arith.constant 0 : index
    %16 = vector.load %arg7[%c0_12, %c0_13] : memref<256x64xbf16, #tpu.memory_space<vmem>>, vector<256x64xbf16>
    %cst_14 = arith.constant dense<0.000000e+00> : vector<8x64xf32>
    %17 = tpu.matmul %11, %16, %cst_14 {dimension_numbers = #tpu.dot_dimension_numbers<[1], [0], [0], [1], [0, 0, 1, 1], [], []>} : vector<8x256xbf16>, vector<256x64xbf16>, vector<8x64xf32> -> vector<8x64xf32>
    %c0_15 = arith.constant 0 : index
    %c0_16 = arith.constant 0 : index
    %18 = vector.load %arg5[%c0_15, %c0_16] : memref<8x8xbf16, #tpu.memory_space<vmem>>, vector<8x8xbf16>
    %19 = arith.truncf %17 : vector<8x64xf32> to vector<8x64xbf16>
    %cst_17 = arith.constant dense<0.000000e+00> : vector<8x64xf32>
    %20 = tpu.matmul %18, %19, %cst_17 {dimension_numbers = #tpu.dot_dimension_numbers<[1], [0], [0], [1], [0, 0, 1, 1], [], []>} : vector<8x8xbf16>, vector<8x64xbf16>, vector<8x64xf32> -> vector<8x64xf32>
    %21 = vector.shape_cast %20 : vector<8x64xf32> to vector<1x8x64xf32>
    %c0_18 = arith.constant 0 : index
    %c0_19 = arith.constant 0 : index
    %c0_20 = arith.constant 0 : index
    %22 = vector.load %arg8[%c0_18, %c0_19, %c0_20] : memref<1x8x64xf32, #tpu.memory_space<vmem>>, vector<1x8x64xf32>
    tpu.vector_store %arg8[%c0_18, %c0_19, %c0_20], %21 {strides = array<i32>} : memref<1x8x64xf32, #tpu.memory_space<vmem>>, vector<1x8x64xf32>,
    return
  }
  func.func @transform_0(%arg0: i32, %arg1: i32) -> (i32, i32, i32) {
    %c0_i32 = arith.constant 0 : i32
    %c0_i32_0 = arith.constant 0 : i32
    return %arg0, %c0_i32, %arg1 : i32, i32, i32
  }
  func.func @transform_1(%arg0: i32, %arg1: i32) -> (i32, i32) {
    %c0_i32 = arith.constant 0 : i32
    %c0_i32_0 = arith.constant 0 : i32
    %c0_i32_1 = arith.constant 0 : i32
    return %c0_i32, %c0_i32_0 : i32, i32
  }
  func.func @transform_2(%arg0: i32, %arg1: i32) -> (i32, i32) {
    %c0_i32 = arith.constant 0 : i32
    %c0_i32_0 = arith.constant 0 : i32
    %c0_i32_1 = arith.constant 0 : i32
    return %c0_i32, %c0_i32_0 : i32, i32
  }
  func.func @transform_3(%arg0: i32, %arg1: i32) -> (i32, i32) {
    %c0_i32 = arith.constant 0 : i32
    %c0_i32_0 = arith.constant 0 : i32
    %c0_i32_1 = arith.constant 0 : i32
    return %c0_i32, %c0_i32_0 : i32, i32
  }
  func.func @transform_4(%arg0: i32, %arg1: i32) -> (i32, i32) {
    %c0_i32 = arith.constant 0 : i32
    %c0_i32_0 = arith.constant 0 : i32
    %c0_i32_1 = arith.constant 0 : i32
    return %c0_i32, %c0_i32_0 : i32, i32
  }
  func.func @transform_5(%arg0: i32, %arg1: i32) -> (i32, i32) {
    %c0_i32 = arith.constant 0 : i32
    %c0_i32_0 = arith.constant 0 : i32
    %c0_i32_1 = arith.constant 0 : i32
    return %c0_i32, %c0_i32_0 : i32, i32
  }
  func.func @transform_6(%arg0: i32, %arg1: i32) -> (i32, i32, i32) {
    %c0_i32 = arith.constant 0 : i32
    %c0_i32_0 = arith.constant 0 : i32
    return %arg0, %c0_i32, %arg1 : i32, i32, i32
  }
  func.func @transform_7(%arg0: i32, %arg1: i32) -> (i32, i32, i32) {
    %c0_i32 = arith.constant 0 : i32
    %c0_i32_0 = arith.constant 0 : i32
    return %arg0, %c0_i32, %arg1 : i32, i32, i32
  }
}

</mosaic_0001>

<bundles_post_ra>
// kernel: tpu_custom_call.1
= control target key start
LH: loop header
LB: loop body
LE: loop exit
PB: predicated region body
PF: predicated region fallthrough
CT: control target
= control target key end

     0   :  { %s1213_s0 = inlined_call_operand.vmem [shape: bf16[2,8,256], index: 0, kind: input, shape index: {}]   ;;  %s1214_s1 = inlined_call_operand.vmem [shape: f32[8,1], index: 1, kind: input, shape index: {}]   ;;  %s1215_s2 = inlined_call_operand.vmem [shape: f32[8,1], index: 2, kind: input, shape index: {}]   ;;  %s1216_s3 = inlined_call_operand.vmem [shape: bf16[8,8], index: 3, kind: input, shape index: {}]   ;;  %s1217_s4 = inlined_call_operand.vmem [shape: bf16[4,8], index: 4, kind: input, shape index: {}]   ;;  %s1218_s5 = inlined_call_operand.vmem [shape: bf16[256,64], index: 5, kind: input, shape index: {}]   ;;  %s1219_s6 = inlined_call_operand.hbm [shape: f32[2,8,64], index: 6, kind: output, shape index: {0}]   ;;  %s1220_s7 = inlined_call_operand.hbm [shape: f32[2,4,256], index: 7, kind: output, shape index: {1}]  }
   0x1   :  { %1221 = sst [smem:[#allocation8_spill]] %s1213_s0 }
   0x2   :  { %1222 = sst [smem:[#allocation9_spill]] %s1214_s1 }
   0x3   :  { %1223 = sst [smem:[#allocation10_spill]] %s1215_s2 }
   0x4   :  { %13 = vsyncpa [#allocation3], 0 }
   0x5   :  { %15 = vsyncpa [#allocation3 + $0x1], 0 }
   0x6   :  { %16 = vsyncpa [#allocation5], 0 }
   0x7   :  { %18 = vsyncpa [#allocation5 + $0x1], 0  ;;  %s1031_s24 = smov 0   ;;  %s1033_s25 = smov 0  }
   0x8   :  { %s1035_s26 = smov 0   ;;  %s1037_s27 = smov 0  }
   0x9   :  { %s1039_s28 = smov 0   ;;  %s1041_s29 = smov 0  }
   0xa LB: > { %s715_s30 = sadd.s32 4294967295, %s988_s29   ;;  %s716_s8 = sadd.s32 4294967294, %s988_s29   ;;  %s988_s29 = sphi %s1041_s29, %s24_s29   ;;  %s984_s28 = sphi %s1039_s28, %s1233_s28   ;;  %s980_s27 = sphi %s1037_s27, %s1232_s27   ;;  %s976_s26 = sphi %s1035_s26, %s1231_s26   ;;  %s972_s25 = sphi %s1033_s25, %s1230_s25   ;;  %s968_s24 = sphi %s1031_s24, %s1229_s24  }
   0xb   : > { %s36_s9 = sadd.s32 1, %s984_s28  ;;  %s178_s10 = sadd.s32 1, %s976_s26 }
   0xc   : > { %p38_p0 = scmp.ge.s32.totalorder %s36_s9, 2  ;;  %p188_p1 = scmp.ne.s32.totalorder %s976_s26, %s972_s25 }
   0xd   : > { %p189_p2 = scmp.eq.s32.totalorder %s715_s30, 1  ;;  %p194_p3 = scmp.ne.s32.totalorder %s972_s25, %s968_s24 }
   0xe   : > { %s1235_s9 = smov (%p38_p0, %s36_s9), 0  ;;  %p195_p5 = scmp.eq.s32.totalorder %s716_s8, 1 }
   0xf   : > { %p1071_p4 = por %p189_p2, %p188_p1  ;;  %s173_s12 = ssub.s32 %s984_s28, %s1235_s9 }
  0x10   : > { %p719_p6 = scmp.ge.s32.totalorder %s988_s29, 1  ;;  %p176_p7 = scmp.eq.s32.totalorder %s173_s12, 0 }
  0x11   : > { %p1078_p8 = por %p195_p5, %p194_p3  ;;  %p269_p9 = scmp.lt.s32.totalorder %s988_s29, 3 }
  0x12   : > { %s1084_s14 = scalar_select %p176_p7, %s976_s26, %s178_s10  }
  0x13   : > { %p270_p10 = pnand %p719_p6, %p269_p9 }
  0x14   : > { %s1226_s1 = sld [smem:[#allocation9_spill]] (!%p270_p10)  ;;  %p311_p11 = scmp.lt.s32.totalorder (!%p270_p10), %s980_s27, 1 }
  0x15   : > { %273 = sbr.rel (%p270_p10) target bundleno = 431 (0x1af), region = 44  ;;  %s1227_s2 = sld [smem:[#allocation10_spill]] (!%p270_p10) }
  0x16   : > { %s1228_s0 = sld [smem:[#allocation8_spill]] (!%p270_p10)  ;;  %s1158_s21 = sand.u32 (!%p270_p10), 1, %s972_s25  }
  0x17   : > { %s793_s22 = sshll.u32 (!%p270_p10), %s980_s27, 3  ;;  %s720_s23 = sshll.u32 (!%p270_p10), %s1158_s21, 3 }
  0x18   : > { %s309_s12 = scalar_lea.vmem (!%p270_p10), [#allocation4], %s720_s23  ;;  %s572_s17 = scalar_lea.sflag (!%p270_p10), [#allocation5], %s1158_s21 }
  0x19   : > { %s602_s15 = sshll.u32 (!%p270_p10), %s309_s12, 4  ;;  %s898_s30 = scalar_lea.hbm (!%p270_p10), %s1220_s7, 16  ;;  %s603_s15 = int_to_ptr.vmem [resolvable:$true] %s602_s15 }
  0x1a   : > { %v325_v0 = vld [vmem:[%s1226_s1] sm:$0xff]  ;;  %v806_v1 = vld [vmem:[%s1218_s5 + $0x38] sm:$0xff]  ;;  %v990_v2 = vmov 0   ;;  %v805_v4 = vld [vmem:[%s1218_s5 + $0x30] sm:$0xff]  ;;  %s312_s8 = scalar_select %p311_p11, %s980_s27, 1  ;;  %vm350_vm0 = vcmask 1043456  }
  0x1b   : > { %877 = vset.pattern.permute.xlu0 %v990_v2  ;;  %v814_v3 = vld [vmem:[%s1218_s5 + $0x78] sm:$0xff]  ;;  %517 = vmatpush.bf16.msra.mxu2 %v806_v1  ;;  %v813_v5 = vld [vmem:[%s1218_s5 + $0x70] sm:$0xff]  ;;  %v804_v6 = vld [vmem:[%s1218_s5 + $0x28] sm:$0xff]  ;;  %vm346_vm1 = vcmask 64512  }
  0x1c   : > { %328 = vperm.xlu0 %877, %v325_v0   ;;  %530 = vmatpush.bf16.msra.mxu3 %v814_v3  ;;  %v333_v7 = vld [vmem:[%s1227_s2] sm:$0xff]  ;;  %v812_v8 = vld [vmem:[%s1218_s5 + $0x68] sm:$0xff]  ;;  %v802_v11 = vld [vmem:[%s1218_s5 + $0x18] sm:$0xff]  ;;  %s798_s10 = sshll.u32 %s312_s8, 3 }
  0x1d   : > { %v803_v9 = vld [vmem:[%s1218_s5 + $0x20] sm:$0xff]  ;;  %v810_v12 = vld [vmem:[%s1218_s5 + $0x58] sm:$0xff]  ;;  %v801_v13 = vld [vmem:[%s1218_s5 + $0x10] sm:$0xff]  ;;  %s318_s16 = scalar_lea.vmem %s1228_s0, %s798_s10  ;;  %s600_s10 = scalar_lea.hbm %s1220_s7, %s793_s22 }
  0x1e   : > { %v811_v10 = vld [vmem:[%s1218_s5 + $0x60] sm:$0xff]  ;;  %v809_v14 = vld [vmem:[%s1218_s5 + $0x50] sm:$0xff]  ;;  %v800_v15 = vld [vmem:[%s1218_s5 + $0x8] sm:$0xff] }
  0x1f   : > { %518 = vmatpush.bf16.msra.mxu2 %v805_v4  ;;  %v808_v16 = vld [vmem:[%s1218_s5 + $0x48] sm:$0xff]  ;;  %v799_v17 = vld [vmem:[%s1218_s5] sm:$0xff] }
  0x20   : > { %531 = vmatpush.bf16.msra.mxu3 %v813_v5  ;;  %v807_v18 = vld [vmem:[%s1218_s5 + $0x40] sm:$0xff] }
  0x21   : > { %v322_v20 = vld [vmem:[%s318_s16] sm:$0xff]  ;;  %s604_s16 = sshll.u32 %s600_s10, 4  ;;  %s605_s16 = int_to_ptr.hbm [resolvable:$true] %s604_s16 }
  0x22   : > { %v323_v21 = vunpack.c.l.bf16 %v322_v20  ;;  %v324_v22 = vunpack.c.h.bf16 %v322_v20  ;;  %v345_v34 = vld [vmem:[%s1217_s4] sm:$0x3]  ;;  %s892_s18 = sshra.s32 %s605_s16, 4  ;;  %s893_s18 = int_to_ptr.hbm [resolvable:$true] %s892_s18 }
  0x23   : > { %519 = vmatpush.bf16.msra.mxu2 %v804_v6  ;;  %v543_v42 = vld [vmem:[%s1216_s3] sm:$0xf]  ;;  %s894_s19 = scalar_lea.hbm %s893_s18, 8  ;;  %p899_p1 = scmp.lt.s32.totalorder %s893_s18, %s1220_s7 }
  0x24   : > { %336 = vperm.xlu0 %877, %v333_v7   ;;  %532 = vmatpush.bf16.msra.mxu3 %v812_v8  ;;  %p895_p12 = scmp.ne.s32.totalorder %s893_s18, %s894_s19  ;;  %p900_p2 = scmp.lt.s32.totalorder %s898_s30, %s894_s19 }
  0x26   : > { %p896_p13 = pnand %p895_p12, %p1071_p4  ;;  %p901_p3 = por %p900_p2, %p899_p1 }
  0x27   : > { %520 = vmatpush.bf16.msra.mxu2 %v803_v9 }
  0x28   : > { %533 = vmatpush.bf16.msra.mxu3 %v811_v10  ;;  %p897_p0 = pneg %p896_p13 }
  0x2a   : > { %p902_p5 = pnand %p901_p3, %p897_p0 }
  0x2b   : > { %521 = vmatpush.bf16.msra.mxu2 %v802_v11 }
  0x2c   : > { %534 = vmatpush.bf16.msra.mxu3 %v810_v12 }
  0x2f   : > { %522 = vmatpush.bf16.msra.mxu2 %v801_v13 }
  0x30   : > { %535 = vmatpush.bf16.msra.mxu3 %v809_v14 }
  0x33   : > { %523 = vmatpush.bf16.msra.mxu2 %v800_v15 }
  0x34   : > { %536 = vmatpush.bf16.msra.mxu3 %v808_v16 }
  0x37   : > { %524 = vmatpush.bf16.msra.mxu2 %v799_v17 }
  0x38   : > { %537 = vmatpush.bf16.msra.mxu3 %v807_v18 }
  0x8e   : > { %v329_v19 = vpop.permute.xlu0 %328 }
  0x8f   : > { %v331_v23 = vmul.f32 %v329_v19, %v323_v21  ;;  %v332_v24 = vmul.f32 %v329_v19, %v324_v22 }
  0x96   : > { %v337_v25 = vpop.permute.xlu0 %336 }
  0x97   : > { %v339_v26 = vadd.f32 %v337_v25, %v331_v23  ;;  %v340_v27 = vadd.f32 %v337_v25, %v332_v24 }
  0x99   : > { %v341_v28 = vmax.f32 %v339_v26, 0.0  ;;  %v342_v29 = vmax.f32 %v340_v27, 0.0 }
  0x9b   : > { %v343_v30 = vpack.c.bf16 %v341_v28, %v341_v28  ;;  %v344_v31 = vpack.c.bf16 %v342_v29, %v342_v29 }
  0x9d   : > { %525 = vmatmul.bf16.vlgmr.msra.gmra.mxu2 %v343_v30  ;;  %538 = vmatmul.bf16.vlgmr.msra.gmra.mxu3 %v344_v31  ;;  %v352_v32 = vsel %vm350_vm0, %v343_v30, 0  ;;  %v355_v33 = vsel %vm350_vm0, %v344_v31, 0 }
  0x9e   : > { %364 = vmatpush.bf16.msra.mxu0 %v352_v32  ;;  %377 = vmatpush.bf16.msra.mxu1 %v355_v33 }
  0xa1   : > { %724 = vmatmul.msk.bf16.vlgmr.msra.gmra.mxu0 %vm346_vm1, %v345_v34  ;;  %725 = vmatmul.msk.bf16.vlgmr.msra.gmra.mxu1 %vm346_vm1, %v345_v34 }
 0x11e   : > { %v366_v35 = vpop.f32.mrf.mxu0  ;;  %v379_v36 = vpop.f32.mrf.mxu1 }
 0x11f   : > { %v385_v47 = vrot.slane %v379_v36, 4 }
 0x120   : > { %v526_v37 = vpop.f32.mrf.mxu2  ;;  %v539_v38 = vpop.f32.mrf.mxu3 }
 0x121   : > { %v540_v39 = vadd.f32 %v539_v38, %v526_v37  ;;  %v386_v48 = vsel %vm350_vm0, %v366_v35, %v385_v47 }
 0x122   : > { %388 = vst [vmem:[%s309_s12] sm:$0xff] %v386_v48 }
 0x123   : > { %v544_v40 = vpack.c.bf16 %v540_v39, %v540_v39 }
 0x125   : > { %v549_v41 = vsel %vm350_vm0, %v544_v40, 0 }
 0x126   : > { %558 = vmatpush.bf16.msrb.mxu0 %v549_v41  ;;  %v368_v43 = vpop.f32.mrf.mxu0  ;;  %v381_v44 = vpop.f32.mrf.mxu1 }
 0x128   : > { %v528_v45 = vpop.f32.mrf.mxu2  ;;  %v541_v46 = vpop.f32.mrf.mxu3 }
 0x129   : > { %790 = vmatmul.msk.bf16.vlgmr.msrb.gmra.mxu0 %vm346_vm1, %v543_v42 }
 0x12a   : > { %905 = shalt.err (!%p902_p5)
}
 0x12b   : > { %817 = dma.vmem_to_hbm [thread:$0]  (%p1071_p4), %s603_s15, 128, %s605_s16, %s572_s17   ;;  %vm564_vm2 = vcmask 523264  }
 0x12c   : > { %s583_s1 = scalar_lea.hbm %s1219_s6, %s793_s22  ;;  %s302_s2 = scalar_lea.vmem [#allocation2], %s720_s23 }
 0x12d   : > { %s585_s27 = sshll.u32 %s302_s2, 4  ;;  %s587_s20 = sshll.u32 %s583_s1, 4  ;;  %s586_s27 = int_to_ptr.vmem [resolvable:$true] %s585_s27  ;;  %s588_s20 = int_to_ptr.hbm [resolvable:$true] %s587_s20 }
 0x12e   : > { %s567_s0 = scalar_lea.sflag [#allocation3], %s1158_s21  ;;  %s920_s18 = sshra.s32 %s588_s20, 4  ;;  %s921_s18 = int_to_ptr.hbm [resolvable:$true] %s920_s18 }
 0x12f   : > { %s922_s19 = scalar_lea.hbm %s921_s18, 8  ;;  %s926_s22 = scalar_lea.hbm %s1219_s6, 16 }
 0x130   : > { %p923_p6 = scmp.ne.s32.totalorder %s921_s18, %s922_s19  ;;  %p927_p10 = scmp.lt.s32.totalorder %s921_s18, %s1219_s6 }
 0x131   : > { %p928_p11 = scmp.lt.s32.totalorder %s926_s22, %s922_s19 }
 0x132   : > { %p924_p7 = pnand %p923_p6, %p1071_p4 }
 0x133   : > { %p929_p12 = por %p928_p11, %p927_p10 }
 0x134   : > { %p925_p9 = pneg %p924_p7 }
 0x136   : > { %p930_p13 = pnand %p929_p12, %p925_p9 }
 0x1a6   : > { %v560_v49 = vpop.f32.mrf.mxu0 }
 0x1a7   : > { %565 = vst.msk [vmem:[%s302_s2] sm:$0xff] %vm564_vm2, %v560_v49 }
 0x1a8   : > { %933 = shalt.err (!%p930_p13)
}
 0x1a9   : > { %816 = dma.vmem_to_hbm [thread:$0]  (%p1071_p4), %s586_s27, 128, %s588_s20, %s567_s0  }
 0x1ae   : > { %v562_v50 = vpop.f32.mrf.mxu0 }
 0x1af PF: > { %p827_p0 = scmp.ge.s32.totalorder %s988_s29, 2  ;;  %s616_s1 = sand.u32 1, %s968_s24  }
 0x1b0   : > { %s617_s2 = scalar_lea.sflag [#allocation3], %s616_s1 }
 0x1b1   : > { %p821_p1 = pnand %p827_p0, %p1078_p8 }
 0x1b3   : > { %p822_p2 = pneg %p821_p1 }
 0x1b5   : > { %959 = dma.done.wait (%p822_p2), %s617_s2, 128  }
 0x1b6   : > { %961 = vsyncadd (%p822_p2), %s617_s2, 4294967168  ;;  %s627_s21 = scalar_lea.sflag [#allocation5], %s616_s1 }
 0x1b7   : > { %963 = dma.done.wait (%p822_p2), %s627_s21, 128  }
 0x1b8   : > { %965 = vsyncadd (%p822_p2), %s627_s21, 4294967168  ;;  %s24_s29 = sadd.s32 1, %s988_s29   ;;  %s1229_s24 = smov %s972_s25 }
 0x1b9   : > { %p21_p3 = scmp.ge.s32.totalorder %s24_s29, 4   ;;  %s1230_s25 = smov %s976_s26 }
 0x1ba   : > { %s1231_s26 = smov %s1084_s14  ;;  %s1232_s27 = smov %s984_s28 }
 0x1bb   : > { %s1233_s28 = smov %s1235_s9  ;;  %23 = sbr.rel (!%p21_p3) target bundleno = 10 (0xa), region = 96 }
 0x1c0   :  { %633 = vsyncpa [#allocation3], 1 }
 0x1c1   :  { %635 = vsyncpa [#allocation3 + $0x1], 1 }
 0x1c2   :  { %636 = vsyncpa [#allocation5], 1 }
 0x1c3   :  { %638 = vsyncpa [#allocation5 + $0x1], 1 }

</bundles_post_ra>
